<compile_context>
chip_gen: v5e
topology: v5e:2x2
jax: 0.10.0
libtpu: 0.0.40
codegen_flags: <defaults>
</compile_context>

<pallas_src>
import jax
import jax.numpy as jnp
from jax.experimental import pallas as pl
from jax.experimental.pallas import tpu as pltpu


def natural_coach_kernel(x_ref, w1_ref, b1_ref, w2_ref, b2_ref, o_ref):
    # fc1: MXU matmul with f32 accumulation; bias + ReLU on the VPU.
    h = jnp.dot(x_ref[...], w1_ref[...], preferred_element_type=jnp.float32)
    h = jnp.maximum(h + b1_ref[...].astype(jnp.float32), 0.0)          # (tile, H)

    # fc2 (output width 1), emitted lane-dense: broadcast w2 to 8 sublane rows
    # and contract over H against h's last axis (NT matmul, same pattern as
    # q @ k^T in flash attention) -> (8, tile); keep row 0.  This yields a
    # (1, tile) lane-dense store instead of a (tile, 1) masked column store.
    H = w2_ref.shape[1]
    w2b = jnp.broadcast_to(w2_ref[...].astype(jnp.float32), (8, H))
    y = jax.lax.dot_general(
        w2b, h, (((1,), (1,)), ((), ())), preferred_element_type=jnp.float32)
    y = y[0:1, :] + b2_ref[0, 0].astype(jnp.float32)                   # (1, tile)
    o_ref[...] = y.astype(o_ref.dtype)


def _round_up(v, m):
    return ((v + m - 1) // m) * m


def natural_coach_forward(x, w1, b1, w2, b2, *, max_batch_tile=8192):
    B, IN = x.shape
    IN_w, H = w1.shape
    assert IN_w == IN
    assert b1.shape == (1, H)
    assert w2.shape == (1, H)
    assert b2.shape == (1, 1)

    itemsize = jnp.dtype(x.dtype).itemsize
    out_itemsize = itemsize

    # ---- batch tile: sized by bytes, not rows -------------------------------
    # Target ~2 MiB of streamed x per grid step; round to 128 rows (covers
    # f32 / bf16 / int8 sublane packing).
    target_rows = (2 << 20) // max(1, IN * itemsize)
    tile = int(min(max(target_rows, 512), max_batch_tile))
    tile = max(128, _round_up(tile, 128))

    # Keep >= 2 grid steps when the batch allows it (v7x dual TensorCores).
    if B >= 256 and pl.cdiv(B, tile) < 2:
        tile = _round_up(pl.cdiv(B, 2), 128)
    # Single-step case: use the exact batch size (full-array blocks; no
    # padding or ragged tail anywhere).
    if tile >= B:
        tile = B

    # ---- VMEM clamp (v7x has only 64 MiB physical) ---------------------------
    # Double-buffered x tile + double-buffered lane-dense out + resident
    # (double-buffered) weights + f32 intermediates must fit with headroom.
    # Shrink the tile rather than over-requesting VMEM.
    fixed_bytes = 2 * (IN * H + 2 * H + 1) * itemsize
    per_row_bytes = 2 * IN * itemsize + 2 * out_itemsize + 3 * H * 4
    budget = 44 << 20
    if fixed_bytes < budget:
        max_rows = max(128, ((budget - fixed_bytes) // per_row_bytes) // 128 * 128)
    else:
        max_rows = 128  # pathological IN; weights alone dominate VMEM
    tile = min(tile, max_rows)

    num_tiles = pl.cdiv(B, tile)
    b_pad = num_tiles * tile
    grid = (num_tiles,)

    vmem_need = fixed_bytes + per_row_bytes * tile
    vmem_limit = None
    if vmem_need > (12 << 20):            # above the smallest default scoped limit
        vmem_limit = int(min(vmem_need + (4 << 20), 48 << 20))

    # ---- advisory cost estimate for the XLA scheduler -------------------------
    flops = 2 * B * IN * H + 2 * B * H * 8 + 3 * B * H
    bytes_accessed = (
        B * IN * itemsize
        + (IN * H + 2 * H + 1) * itemsize
        + B * out_itemsize
    )
    cost = pl.CostEstimate(flops=flops, transcendentals=0,
                           bytes_accessed=bytes_accessed)

    out = pl.pallas_call(
        natural_coach_kernel,
        out_shape=jax.ShapeDtypeStruct((1, b_pad), x.dtype),
        grid_spec=pl.GridSpec(
            grid=grid,
            in_specs=[
                pl.BlockSpec((tile, IN), lambda i: (i, 0)),   # x (streamed; ragged tail OK)
                pl.BlockSpec((IN, H), lambda i: (0, 0)),      # w1 (resident)
                pl.BlockSpec((1, H), lambda i: (0, 0)),       # b1 (resident)
                pl.BlockSpec((1, H), lambda i: (0, 0)),       # w2 (resident)
                pl.BlockSpec(memory_space=pltpu.MemorySpace.SMEM),  # b2 scalar
            ],
            out_specs=pl.BlockSpec((1, tile), lambda i: (0, i)),     # lane-dense out
        ),
        compiler_params=pltpu.CompilerParams(
            dimension_semantics=("parallel",),
            vmem_limit_bytes=vmem_limit,
        ),
        cost_estimate=cost,
    )(x, w1, b1, w2, b2)

    return out[0, :B].reshape(B, 1)


def init_params(key, input_size, hidden_size=64, dtype=jnp.float32):
    """Deterministic synthetic params matching nn.Linear init (fc1 pre-transposed).

    Note: keep b2 as a 32-bit dtype (it is read as a scalar from SMEM).
    """
    k1, k2, k3, k4 = jax.random.split(key, 4)
    bound1 = 1.0 / jnp.sqrt(input_size)
    # PyTorch fc1.weight is (H, IN); store its transpose (IN, H).
    w1 = jax.random.uniform(k1, (input_size, hidden_size), dtype, -bound1, bound1)
    b1 = jax.random.uniform(k2, (1, hidden_size), dtype, -bound1, bound1)
    bound2 = 1.0 / jnp.sqrt(hidden_size)
    # PyTorch fc2.weight is (1, H); keep that layout.
    w2 = jax.random.uniform(k3, (1, hidden_size), dtype, -bound2, bound2)
    b2 = jax.random.uniform(k4, (1, 1), dtype, -bound2, bound2)
    return w1, b1, w2, b2


def _reference(x, w1, b1, w2, b2):
    return jnp.maximum(x @ w1 + b1, 0.0) @ w2.T + b2


if __name__ == "__main__":
    key = jax.random.PRNGKey(0)
    k_x, k_p = jax.random.split(key)

    batch = 203          # deliberately not a multiple of 128
    input_size = 32
    hidden_size = 64

    x = jax.random.normal(k_x, (batch, input_size), dtype=jnp.float32)
    w1, b1, w2, b2 = init_params(k_p, input_size, hidden_size)
    ref = _reference(x, w1, b1, w2, b2)

    # Auto-sized single-step path (tile == batch, full-array blocks, no padding).
    out = jax.block_until_ready(natural_coach_forward(x, w1, b1, w2, b2))
    assert out.shape == (batch, 1)
    assert jnp.allclose(out, ref, atol=1e-4, rtol=1e-4)

    # Forced multi-step path (grid > 1, ragged last x block, lane-dense output).
    out2 = jax.block_until_ready(
        natural_coach_forward(x, w1, b1, w2, b2, max_batch_tile=128))
    assert out2.shape == (batch, 1)
    assert jnp.allclose(out2, ref, atol=1e-4, rtol=1e-4)

    # TODO(synk): importdata() (JSON dataset loading) is host-side I/O, not part
    # of the forward pass, so it is intentionally not translated.
    print("KERNEL_OK")
</pallas_src>

<mosaic_0001>
module attributes {stable_mosaic.version = 11 : i64} {
  func.func @natural_coach_kernel(%arg0: i32, %arg1: memref<203x32xf32, #tpu.memory_space<vmem>>, %arg2: memref<32x64xf32, #tpu.memory_space<vmem>>, %arg3: memref<1x64xf32, #tpu.memory_space<vmem>>, %arg4: memref<1x64xf32, #tpu.memory_space<vmem>>, %arg5: memref<1x1xf32, #tpu.memory_space<smem>>, %arg6: memref<1x203xf32, #tpu.memory_space<vmem>>) attributes {dimension_semantics = [#tpu.dimension_semantics<parallel>], iteration_bounds = array<i64: 1>, scalar_prefetch = 0 : i64, scratch_operands = 0 : i64, tpu.core_type = #tpu.core_type<tc>, window_params = [{transform_indices = @transform_0, window_bounds = array<i64: 203, 32>}, {pipeline_mode = #tpu.pipeline_mode<synchronous>, transform_indices = @transform_1, window_bounds = array<i64: 32, 64>}, {pipeline_mode = #tpu.pipeline_mode<synchronous>, transform_indices = @transform_2, window_bounds = array<i64: 1, 64>}, {pipeline_mode = #tpu.pipeline_mode<synchronous>, transform_indices = @transform_3, window_bounds = array<i64: 1, 64>}, {transform_indices = @transform_4, window_bounds = array<i64: 1, 1>}, {transform_indices = @transform_5, window_bounds = array<i64: 1, 203>}]} {
    %c0 = arith.constant 0 : index
    %c0_0 = arith.constant 0 : index
    %0 = vector.load %arg1[%c0, %c0_0] : memref<203x32xf32, #tpu.memory_space<vmem>>, vector<203x32xf32>
    %c0_1 = arith.constant 0 : index
    %c0_2 = arith.constant 0 : index
    %1 = vector.load %arg2[%c0_1, %c0_2] : memref<32x64xf32, #tpu.memory_space<vmem>>, vector<32x64xf32>
    %cst = arith.constant dense<0.000000e+00> : vector<203x64xf32>
    %2 = tpu.matmul %0, %1, %cst {dimension_numbers = #tpu.dot_dimension_numbers<[1], [0], [0], [1], [0, 0, 1, 1], [], []>} : vector<203x32xf32>, vector<32x64xf32>, vector<203x64xf32> -> vector<203x64xf32>
    %c0_3 = arith.constant 0 : index
    %c0_4 = arith.constant 0 : index
    %3 = vector.load %arg3[%c0_3, %c0_4] : memref<1x64xf32, #tpu.memory_space<vmem>>, vector<1x64xf32>
    %4 = vector.broadcast %3 : vector<1x64xf32> to vector<203x64xf32>
    %5 = arith.addf %2, %4 : vector<203x64xf32>
    %cst_5 = arith.constant 0.000000e+00 : f32
    %6 = vector.broadcast %cst_5 : f32 to vector<203x64xf32>
    %7 = arith.maximumf %5, %6 : vector<203x64xf32>
    %c0_6 = arith.constant 0 : index
    %c0_7 = arith.constant 0 : index
    %8 = vector.load %arg4[%c0_6, %c0_7] : memref<1x64xf32, #tpu.memory_space<vmem>>, vector<1x64xf32>
    %9 = vector.shape_cast %8 : vector<1x64xf32> to vector<1x64xf32>
    %10 = vector.broadcast %9 : vector<1x64xf32> to vector<8x64xf32>
    %cst_8 = arith.constant dense<0.000000e+00> : vector<8x203xf32>
    %11 = tpu.matmul %10, %7, %cst_8 {dimension_numbers = #tpu.dot_dimension_numbers<[1], [1], [0], [0], [0, 0, 1, 0], [], []>} : vector<8x64xf32>, vector<203x64xf32>, vector<8x203xf32> -> vector<8x203xf32>
    %12 = vector.extract_strided_slice %11 {offsets = [0, 0], sizes = [1, 203], strides = [1, 1]} : vector<8x203xf32> to vector<1x203xf32>
    %c0_9 = arith.constant 0 : index
    %c0_10 = arith.constant 0 : index
    %13 = memref.load %arg5[%c0_9, %c0_10] : memref<1x1xf32, #tpu.memory_space<smem>>
    %14 = vector.broadcast %13 : f32 to vector<1x203xf32>
    %15 = arith.addf %12, %14 : vector<1x203xf32>
    %c0_11 = arith.constant 0 : index
    %c0_12 = arith.constant 0 : index
    %16 = vector.load %arg6[%c0_11, %c0_12] : memref<1x203xf32, #tpu.memory_space<vmem>>, vector<1x203xf32>
    tpu.vector_store %arg6[%c0_11, %c0_12], %15 {strides = array<i32>} : memref<1x203xf32, #tpu.memory_space<vmem>>, vector<1x203xf32>,
    return
  }
  func.func @transform_0(%arg0: i32) -> (i32, i32) {
    %c0_i32 = arith.constant 0 : i32
    %c0_i32_0 = arith.constant 0 : i32
    return %arg0, %c0_i32 : i32, i32
  }
  func.func @transform_1(%arg0: i32) -> (i32, i32) {
    %c0_i32 = arith.constant 0 : i32
    %c0_i32_0 = arith.constant 0 : i32
    %c0_i32_1 = arith.constant 0 : i32
    return %c0_i32, %c0_i32_0 : i32, i32
  }
  func.func @transform_2(%arg0: i32) -> (i32, i32) {
    %c0_i32 = arith.constant 0 : i32
    %c0_i32_0 = arith.constant 0 : i32
    %c0_i32_1 = arith.constant 0 : i32
    return %c0_i32, %c0_i32_0 : i32, i32
  }
  func.func @transform_3(%arg0: i32) -> (i32, i32) {
    %c0_i32 = arith.constant 0 : i32
    %c0_i32_0 = arith.constant 0 : i32
    %c0_i32_1 = arith.constant 0 : i32
    return %c0_i32, %c0_i32_0 : i32, i32
  }
  func.func @transform_4(%arg0: i32) -> (i32, i32) {
    %c0_i32 = arith.constant 0 : i32
    %c0_i32_0 = arith.constant 0 : i32
    %c0_i32_1 = arith.constant 0 : i32
    return %c0_i32, %c0_i32_0 : i32, i32
  }
  func.func @transform_5(%arg0: i32) -> (i32, i32) {
    %c0_i32 = arith.constant 0 : i32
    %c0_i32_0 = arith.constant 0 : i32
    return %c0_i32, %arg0 : i32, i32
  }
}

</mosaic_0001>

<bundles_post_ra>
// kernel: tpu_custom_call.1
= control target key start
LH: loop header
LB: loop body
LE: loop exit
PB: predicated region body
PF: predicated region fallthrough
CT: control target
= control target key end

     0   :  { %vm56_vm0 = vcmask 261120   ;;  %s738_s0 = inlined_call_operand.vmem [shape: f32[203,32], index: 0, kind: input, shape index: {}]   ;;  %s739_s1 = inlined_call_operand.vmem [shape: f32[32,64], index: 1, kind: input, shape index: {}]   ;;  %s740_s2 = inlined_call_operand.vmem [shape: f32[1,64], index: 2, kind: input, shape index: {}]   ;;  %s741_s3 = inlined_call_operand.vmem [shape: f32[1,64], index: 3, kind: input, shape index: {}]   ;;  %s742_s4 = inlined_call_operand.<no memory space> [shape: f32[1,1], index: 4, kind: input, shape index: {}]   ;;  %s743_s5 = inlined_call_operand.hbm [shape: f32[1,203], index: 5, kind: output, shape index: {}]  }
   0x1   :  { %v51_v0 = vld [vmem:[%s739_s1 + $0x18] sm:$0xff]  ;;  %v50_v1 = vld [vmem:[%s739_s1 + $0x10] sm:$0xff]  ;;  %v49_v2 = vld [vmem:[%s739_s1 + $0x8] sm:$0xff] }
   0x2   :  { %147 = vmatpush.msra.mxu0 %v51_v0  ;;  %465 = vmatpush.msra.mxu2 %v51_v0  ;;  %v48_v3 = vld [vmem:[%s739_s1] sm:$0xff]  ;;  %v32_v5 = vld [vmem:[%s738_s0 + $0x50] sm:$0xff]  ;;  %v39_v6 = vld [vmem:[%s738_s0 + $0x88] sm:$0xff] }
   0x3   :  { %466 = vmatpush.msra.mxu3 %v51_v0  ;;  %v22_v4 = vld [vmem:[%s738_s0] sm:$0xff] }
   0x4   :  { %148 = vmatpush.msra.mxu0 %v50_v1  ;;  %467 = vmatpush.msra.mxu2 %v50_v1 }
   0x5   :  { %468 = vmatpush.msra.mxu3 %v50_v1 }
   0x6   :  { %149 = vmatpush.msra.mxu0 %v49_v2  ;;  %469 = vmatpush.msra.mxu2 %v49_v2 }
   0x7   :  { %470 = vmatpush.msra.mxu3 %v49_v2 }
   0x8   :  { %11 = vsyncpa [#allocation4], 0  ;;  %150 = vmatpush.msra.mxu0 %v48_v3  ;;  %471 = vmatpush.msra.mxu2 %v48_v3  ;;  %v23_v7 = vld [vmem:[%s738_s0 + $0x8] sm:$0xff]  ;;  %v33_v8 = vld [vmem:[%s738_s0 + $0x58] sm:$0xff]  ;;  %vm259_vm1 = vcmask 523264   ;;  %s502_s30 = smov [#allocation3]  }
   0x9   :  { %472 = vmatpush.msra.mxu3 %v48_v3  ;;  %411 = vmatmul.msk.f32.vlgmr.msra.gmra.mxu0 %vm56_vm0, %v22_v4  ;;  %v40_v9 = vld [vmem:[%s738_s0 + $0x90] sm:$0xff]  ;;  %v34_v11 = vld [vmem:[%s738_s0 + $0x60] sm:$0xff]  ;;  %v41_v12 = vld [vmem:[%s738_s0 + $0x98] sm:$0xff]  ;;  %s400_s6 = sshll.u32 %s502_s30, 4  ;;  %s402_s7 = sshll.u32 %s743_s5, 4  ;;  %vm387_vm2 = vcmask 1040384   ;;  %s401_s6 = int_to_ptr.vmem [resolvable:$true] %s400_s6  ;;  %s403_s7 = int_to_ptr.hbm [resolvable:$true] %s402_s7 }
   0xa   :  { %421 = vmatmul.msk.f32.vlgmr.msra.gmra.mxu2 %vm56_vm0, %v32_v5  ;;  %428 = vmatmul.msk.f32.vlgmr.msra.gmra.mxu3 %vm56_vm0, %v39_v6  ;;  %v24_v10 = vld [vmem:[%s738_s0 + $0x10] sm:$0xff]  ;;  %v25_v13 = vld [vmem:[%s738_s0 + $0x18] sm:$0xff]  ;;  %v35_v14 = vld [vmem:[%s738_s0 + $0x68] sm:$0xff] }
   0xb   :  { %v42_v15 = vld [vmem:[%s738_s0 + $0xa0] sm:$0xff]  ;;  %v36_v17 = vld [vmem:[%s738_s0 + $0x70] sm:$0xff]  ;;  %v43_v18 = vld [vmem:[%s738_s0 + $0xa8] sm:$0xff] }
   0xc   :  { %v26_v16 = vld [vmem:[%s738_s0 + $0x20] sm:$0xff]  ;;  %v27_v19 = vld [vmem:[%s738_s0 + $0x28] sm:$0xff]  ;;  %v37_v20 = vld [vmem:[%s738_s0 + $0x78] sm:$0xff] }
   0xd   :  { %v44_v21 = vld [vmem:[%s738_s0 + $0xb0] sm:$0xff]  ;;  %v45_v23 = vld [vmem:[%s738_s0 + $0xb8] sm:$0xff]  ;;  %v38_v24 = vld [vmem:[%s738_s0 + $0x80] sm:$0xff] }
   0xe   :  { %v28_v22 = vld [vmem:[%s738_s0 + $0x30] sm:$0xff]  ;;  %v29_v25 = vld [vmem:[%s738_s0 + $0x38] sm:$0xff]  ;;  %v46_v26 = vld [vmem:[%s738_s0 + $0xc0] sm:$0xff] }
   0xf   :  { %v30_v27 = vld [vmem:[%s738_s0 + $0x40] sm:$0xff]  ;;  %v47_v28 = vld [vmem:[%s738_s0 + $0xc8] sm:$0x7] }
  0x10   :  { %v31_v29 = vld [vmem:[%s738_s0 + $0x48] sm:$0xff]  ;;  %v666_v46 = vld [vmem:[%s740_s2] ss:$0 sm:$0xff] }
  0x11   :  { %412 = vmatmul.msk.f32.gmra.mxu0 %vm56_vm0, %v23_v7 }
  0x12   :  { %422 = vmatmul.msk.f32.gmra.mxu2 %vm56_vm0, %v33_v8  ;;  %429 = vmatmul.msk.f32.gmra.mxu3 %vm56_vm0, %v40_v9 }
  0x19   :  { %413 = vmatmul.msk.f32.gmra.mxu0 %vm56_vm0, %v24_v10 }
  0x1a   :  { %423 = vmatmul.msk.f32.gmra.mxu2 %vm56_vm0, %v34_v11  ;;  %430 = vmatmul.msk.f32.gmra.mxu3 %vm56_vm0, %v41_v12 }
  0x21   :  { %414 = vmatmul.msk.f32.gmra.mxu0 %vm56_vm0, %v25_v13 }
  0x22   :  { %424 = vmatmul.msk.f32.gmra.mxu2 %vm56_vm0, %v35_v14  ;;  %431 = vmatmul.msk.f32.gmra.mxu3 %vm56_vm0, %v42_v15 }
  0x29   :  { %415 = vmatmul.msk.f32.gmra.mxu0 %vm56_vm0, %v26_v16 }
  0x2a   :  { %425 = vmatmul.msk.f32.gmra.mxu2 %vm56_vm0, %v36_v17  ;;  %432 = vmatmul.msk.f32.gmra.mxu3 %vm56_vm0, %v43_v18 }
  0x31   :  { %416 = vmatmul.msk.f32.gmra.mxu0 %vm56_vm0, %v27_v19 }
  0x32   :  { %426 = vmatmul.msk.f32.gmra.mxu2 %vm56_vm0, %v37_v20  ;;  %433 = vmatmul.msk.f32.gmra.mxu3 %vm56_vm0, %v44_v21 }
  0x39   :  { %417 = vmatmul.msk.f32.gmra.mxu0 %vm56_vm0, %v28_v22 }
  0x3a   :  { %434 = vmatmul.msk.f32.gmra.mxu3 %vm56_vm0, %v45_v23  ;;  %427 = vmatmul.msk.f32.gmra.mxu2 %vm56_vm0, %v38_v24 }
  0x41   :  { %418 = vmatmul.msk.f32.gmra.mxu0 %vm56_vm0, %v29_v25 }
  0x42   :  { %435 = vmatmul.msk.f32.gmra.mxu3 %vm56_vm0, %v46_v26 }
  0x49   :  { %419 = vmatmul.msk.f32.gmra.mxu0 %vm56_vm0, %v30_v27 }
  0x4a   :  { %436 = vmatmul.msk.f32.gmra.mxu3 %vm56_vm0, %v47_v28 }
  0x51   :  { %420 = vmatmul.msk.f32.gmra.mxu0 %vm56_vm0, %v31_v29 }
  0x86   :  { %v649_v30 = vpop.f32.mrf.mxu0 }
  0x8d   :  { %v182_v31 = vpop.f32.mrf.mxu2  ;;  %v651_v32 = vpop.f32.mrf.mxu3 }
  0x8e   :  { %v653_v33 = vpop.f32.mrf.mxu0  ;;  %v183_v63 = vadd.f32 %v666_v46, %v182_v31 }
  0x90   :  { %v240_v1 = vmax.f32 %v183_v63, 0.0 }
  0x95   :  { %v185_v34 = vpop.f32.mrf.mxu2  ;;  %v655_v35 = vpop.f32.mrf.mxu3 }
  0x96   :  { %v657_v36 = vpop.f32.mrf.mxu0  ;;  %v186_v59 = vadd.f32 %v666_v46, %v185_v34  ;;  %v207_v31 = vadd.f32 %v666_v46, %v655_v35 }
  0x98   :  { %v241_v0 = vmax.f32 %v186_v59, 0.0 }
  0x9d   :  { %v188_v37 = vpop.f32.mrf.mxu2  ;;  %v659_v38 = vpop.f32.mrf.mxu3 }
  0x9e   :  { %v661_v39 = vpop.f32.mrf.mxu0  ;;  %v189_v57 = vadd.f32 %v666_v46, %v188_v37  ;;  %v210_v26 = vadd.f32 %v666_v46, %v659_v38  ;;  %v159_v37 = vadd.f32 %v666_v46, %v657_v36 }
  0x9f   :  { %v162_v28 = vadd.f32 %v666_v46, %v661_v39  ;;  %v204_v39 = vadd.f32 %v666_v46, %v651_v32 }
  0xa0   :  { %v242_v60 = vmax.f32 %v189_v57, 0.0  ;;  %v249_v34 = vmax.f32 %v210_v26, 0.0 }
  0xa1   :  { %v247_v36 = vmax.f32 %v204_v39, 0.0 }
  0xa5   :  { %v191_v40 = vpop.f32.mrf.mxu2  ;;  %v212_v41 = vpop.f32.mrf.mxu3 }
  0xa6   :  { %v164_v42 = vpop.f32.mrf.mxu0  ;;  %v192_v53 = vadd.f32 %v666_v46, %v191_v40  ;;  %v213_v22 = vadd.f32 %v666_v46, %v212_v41  ;;  %v233_v40 = vmax.f32 %v162_v28, 0.0  ;;  %v248_v41 = vmax.f32 %v207_v31, 0.0 }
  0xa7   :  { %v165_v24 = vadd.f32 %v666_v46, %v164_v42  ;;  %v156_v42 = vadd.f32 %v666_v46, %v653_v33  ;;  %v475_v33 = vld [vmem:[%s741_s3] ss:$0 sm:$0xff] }
  0xa8   :  { %v243_v58 = vmax.f32 %v192_v53, 0.0  ;;  %v250_v27 = vmax.f32 %v213_v22, 0.0 }
  0xa9   :  { %v234_v29 = vmax.f32 %v165_v24, 0.0 }
  0xad   :  { %v194_v43 = vpop.f32.mrf.mxu2  ;;  %v215_v44 = vpop.f32.mrf.mxu3 }
  0xae   :  { %v167_v45 = vpop.f32.mrf.mxu0  ;;  %v195_v51 = vadd.f32 %v666_v46, %v194_v43  ;;  %v216_v18 = vadd.f32 %v666_v46, %v215_v44  ;;  %v232_v43 = vmax.f32 %v159_v37, 0.0  ;;  %v153_v44 = vadd.f32 %v666_v46, %v649_v30 }
  0xaf   :  { %v168_v20 = vadd.f32 %v666_v46, %v167_v45  ;;  %v231_v45 = vmax.f32 %v156_v42, 0.0  ;;  %v381_v30 = vstv %s742_s4 }
  0xb0   :  { %v244_v54 = vmax.f32 %v195_v51, 0.0  ;;  %v251_v23 = vmax.f32 %v216_v18, 0.0  ;;  %v230_v32 = vmax.f32 %v153_v44, 0.0 }
  0xb1   :  { %v235_v25 = vmax.f32 %v168_v20, 0.0 }
  0xb5   :  { %v197_v47 = vpop.f32.mrf.mxu2  ;;  %v218_v48 = vpop.f32.mrf.mxu3 }
  0xb6   :  { %v198_v49 = vadd.f32 %v666_v46, %v197_v47  ;;  %v170_v50 = vpop.f32.mrf.mxu0  ;;  %v219_v14 = vadd.f32 %v666_v46, %v218_v48  ;;  %v390_v48 = vlaneseq }
  0xb7   :  { %v171_v16 = vadd.f32 %v666_v46, %v170_v50 }
  0xb8   :  { %v245_v52 = vmax.f32 %v198_v49, 0.0  ;;  %v252_v19 = vmax.f32 %v219_v14, 0.0  ;;  %vm392_vm3 = vcmp.lt.s32.totalorder %v390_v48, 203 }
  0xb9   :  { %v236_v21 = vmax.f32 %v171_v16, 0.0 }
  0xba   :  { %437 = vmatpush.xpose.msk.msra.mxu1 %vm259_vm1, %v245_v52 }
  0xbd   :  { %v221_v55 = vpop.f32.mrf.mxu3  ;;  %v200_v38 = vpop.f32.mrf.mxu2 }
  0xbe   :  { %438 = vmatpush.xpose.msk.msra.mxu1 %vm259_vm1, %v244_v54  ;;  %v173_v56 = vpop.f32.mrf.mxu0  ;;  %v222_v10 = vadd.f32 %v666_v46, %v221_v55  ;;  %v201_v35 = vadd.f32 %v666_v46, %v200_v38 }
  0xbf   :  { %v174_v12 = vadd.f32 %v666_v46, %v173_v56 }
  0xc0   :  { %v253_v15 = vmax.f32 %v222_v10, 0.0  ;;  %v246_v47 = vmax.f32 %v201_v35, 0.0 }
  0xc1   :  { %v237_v17 = vmax.f32 %v174_v12, 0.0 }
  0xc2   :  { %439 = vmatpush.xpose.msk.msra.mxu1 %vm259_vm1, %v243_v58 }
  0xc5   :  { %v224_v61 = vpop.f32.mrf.mxu3 }
  0xc6   :  { %440 = vmatpush.xpose.msk.msra.mxu1 %vm259_vm1, %v242_v60  ;;  %v176_v62 = vpop.f32.mrf.mxu0  ;;  %v225_v6 = vadd.f32 %v666_v46, %v224_v61 }
  0xc7   :  { %v177_v8 = vadd.f32 %v666_v46, %v176_v62 }
  0xc8   :  { %v254_v11 = vmax.f32 %v225_v6, 0.0 }
  0xc9   :  { %v238_v13 = vmax.f32 %v177_v8, 0.0 }
  0xca   :  { %441 = vmatpush.xpose.msk.msra.mxu1 %vm259_vm1, %v241_v0 }
  0xcd   :  { %v227_v2 = vpop.f32.mrf.mxu3 }
  0xce   :  { %v228_v3 = vadd.f32 %v666_v46, %v227_v2  ;;  %442 = vmatpush.xpose.msk.msra.mxu1 %vm259_vm1, %v240_v1  ;;  %v179_v4 = vpop.f32.mrf.mxu0 }
  0xcf   :  { %v180_v5 = vadd.f32 %v666_v46, %v179_v4 }
  0xd0   :  { %v255_v7 = vmax.f32 %v228_v3, 0.0 }
  0xd1   :  { %v239_v9 = vmax.f32 %v180_v5, 0.0 }
  0xd2   :  { %454 = vmatpush.xpose.msk.msrb.mxu2 %vm259_vm1, %v255_v7 }
  0xd3   :  { %443 = vmatpush.xpose.msk.msra.mxu1 %vm259_vm1, %v239_v9 }
  0xd6   :  { %455 = vmatpush.xpose.msk.msrb.mxu2 %vm259_vm1, %v254_v11 }
  0xd7   :  { %444 = vmatpush.xpose.msk.msra.mxu1 %vm259_vm1, %v238_v13 }
  0xda   :  { %456 = vmatpush.xpose.msk.msrb.mxu2 %vm259_vm1, %v253_v15 }
  0xdb   :  { %445 = vmatpush.xpose.msk.msra.mxu1 %vm259_vm1, %v237_v17 }
  0xde   :  { %457 = vmatpush.xpose.msk.msrb.mxu2 %vm259_vm1, %v252_v19 }
  0xdf   :  { %446 = vmatpush.xpose.msk.msra.mxu1 %vm259_vm1, %v236_v21 }
  0xe2   :  { %458 = vmatpush.xpose.msk.msrb.mxu2 %vm259_vm1, %v251_v23 }
  0xe3   :  { %447 = vmatpush.xpose.msk.msra.mxu1 %vm259_vm1, %v235_v25 }
  0xe6   :  { %459 = vmatpush.xpose.msk.msrb.mxu2 %vm259_vm1, %v250_v27 }
  0xe7   :  { %448 = vmatpush.xpose.msk.msra.mxu1 %vm259_vm1, %v234_v29 }
  0xea   :  { %460 = vmatpush.xpose.msk.msrb.mxu2 %vm259_vm1, %v249_v34 }
  0xeb   :  { %449 = vmatpush.xpose.msk.msra.mxu1 %vm259_vm1, %v233_v40 }
  0xee   :  { %461 = vmatpush.xpose.msk.msrb.mxu2 %vm259_vm1, %v248_v41 }
  0xef   :  { %450 = vmatpush.xpose.msk.msra.mxu1 %vm259_vm1, %v232_v43 }
  0xf2   :  { %462 = vmatpush.xpose.msk.msrb.mxu2 %vm259_vm1, %v247_v36 }
  0xf3   :  { %451 = vmatpush.xpose.msk.msra.mxu1 %vm259_vm1, %v231_v45 }
  0xf6   :  { %463 = vmatpush.xpose.msk.msrb.mxu2 %vm259_vm1, %v246_v47 }
  0xf7   :  { %452 = vmatpush.xpose.msk.msra.mxu1 %vm259_vm1, %v230_v32 }
  0xf9   :  { %464 = vmatmul.msk.f32.vlgmr.msrb.gmra.mxu2 %vm259_vm1, %v475_v33 }
  0xfa   :  { %453 = vmatmul.msk.f32.vlgmr.msra.gmra.mxu1 %vm259_vm1, %v475_v33 }
 0x177   :  { %v357_v46 = vpop.f32.mrf.mxu1 }
 0x178   :  { %v382_v51 = vadd.f32 %v381_v30, %v357_v46 }
 0x17c   :  { %v377_v49 = vpop.f32.mrf.mxu2 }
 0x17d   :  { %v383_v50 = vadd.f32 %v381_v30, %v377_v49 }
 0x17f   :  { %v386_v52 = vrot.slane %v383_v50, 7 }
 0x181   :  { %v388_v53 = vsel %vm387_vm2, %v382_v51, %v386_v52 }
 0x182   :  { %394 = vst.msk [vmem:[#allocation3] sm:$0x3] %vm392_vm3, %v388_v53 }
 0x183   :  { %405 = dma.vmem_to_hbm [thread:$0]  %s401_s6, 32, %s403_s7, [#allocation4]  }
 0x184   :  { %500 = dma.done.wait [#allocation4], 32  }
 0x185   :  { %501 = vsyncadd [#allocation4], 4294967264 }
 0x186   :  { %410 = vsyncpa [#allocation4], 1 }

</bundles_post_ra>
